<compile_context>
chip_gen: v5e
topology: v5e:2x2
jax: 0.10.0
libtpu: 0.0.40
codegen_flags: <defaults>
</compile_context>

<pallas_src>
import functools

import jax
import jax.numpy as jnp
from jax.experimental import pallas as pl
from jax.experimental.pallas import tpu as pltpu


def _fused_linear_kernel(xT_ref, p_ref, oT_ref, *, in_features):
    # p_ref columns [0, in_features)   : W                  (out_features, in_features)
    # p_ref column  [in_features]      : bias + other       (out_features, 1)
    w = p_ref[:, 0:in_features]
    b = p_ref[:, in_features:in_features + 1]
    # (OUT, IN) @ (IN, tb) -> (OUT, tb); MXU is massively under-filled but the
    # kernel is HBM-bound, so that is irrelevant.  Add + ReLU are free VPU filler.
    y = jnp.dot(w, xT_ref[...], preferred_element_type=jnp.float32)
    oT_ref[...] = jnp.maximum(y + b, 0.0).astype(oT_ref.dtype)


def pack_params(weight, bias, other):
    """Fold (bias + other) and pack with W into one slab, once, outside the kernel.

    weight: (out_features, in_features)  (PyTorch Linear layout)
    bias, other: (out_features,)
    returns: (out_features, in_features + 1) parameter slab.
    """
    out_features, _ = weight.shape
    col = (bias + other).reshape(out_features, 1)
    return jnp.concatenate([weight, col], axis=1)


def _choose_tb(B, block_b):
    """Pick the batch (lane) tile size."""
    if B <= 512:
        # Single block spanning the full batch.  A block dim equal to the full
        # array dim is exempt from the multiple-of-128 rule.
        return B
    # Lane-dense tiles: multiple of 128, capped at block_b, and at least 2
    # blocks so the "parallel" grid axis can shard across v7x's 2 TensorCores.
    tb = min(block_b, pl.cdiv(B, 2))
    tb = max(128, (tb // 128) * 128)
    return tb


def linear_add_relu_pallas(x, packed_params, *, block_b=16384, out_dtype=None):
    """x: (B, in_features); packed_params: (out_features, in_features + 1)."""
    B, in_features = x.shape
    out_features = packed_params.shape[0]
    assert packed_params.shape == (out_features, in_features + 1)
    # Keeping f32 output to match the PyTorch module; pass out_dtype=jnp.bfloat16
    # to halve the store stream (~30% wall-clock) if the consumer tolerates it.
    out_dtype = out_dtype or x.dtype

    # Layout plumbing: put the batch on the 128-lane axis.  In a real model the
    # activations would be kept in this (features, batch) layout end-to-end.
    xT = x.T  # (in_features, B)

    tb = _choose_tb(B, block_b)
    grid = (pl.cdiv(B, tb),)

    kernel = functools.partial(_fused_linear_kernel, in_features=in_features)

    oT = pl.pallas_call(
        kernel,
        out_shape=jax.ShapeDtypeStruct((out_features, B), out_dtype),
        grid=grid,
        in_specs=[
            # Lane-dense activation tile: (8, tb), tb a multiple of 128 (or full B).
            pl.BlockSpec((in_features, tb), lambda i: (0, i)),
            # Tiny resident parameter slab, constant index -> fetched once.
            pl.BlockSpec((out_features, in_features + 1), lambda i: (0, 0)),
        ],
        # Lane-dense output tile: (16, tb) -> unmasked full-lane stores.
        out_specs=pl.BlockSpec((out_features, tb), lambda i: (0, i)),
        compiler_params=pltpu.CompilerParams(
            dimension_semantics=("parallel",),
            # Explicit limit: safe headroom on v7x's 64 MiB physical / 32 MiB
            # default-scoped VMEM while still raising v5e's 16 MiB default.
            vmem_limit_bytes=32 * 1024 * 1024,
        ),
    )(xT, packed_params)

    return oT.T  # (B, out_features)


def linear_add_relu(x, packed_params, *, min_pallas_batch=1024, block_b=16384):
    """Dispatcher: tiny batches are pure pallas_call fixed overhead, so let XLA
    fuse dot+add+relu below a threshold; use the Pallas kernel for large B."""
    B = x.shape[0]
    in_features = packed_params.shape[1] - 1
    if B < min_pallas_batch:
        w = packed_params[:, :in_features]
        b = packed_params[:, in_features]
        return jnp.maximum(x @ w.T + b, 0.0)
    return linear_add_relu_pallas(x, packed_params, block_b=block_b)


if __name__ == "__main__":
    key = jax.random.PRNGKey(0)
    kx, kw, kb, ko, kx2 = jax.random.split(key, 5)

    B, IN, OUT = 8, 8, 16
    x1 = jax.random.normal(kx, (B, IN), dtype=jnp.float32)

    # Deterministic "parameters" (torch.nn.Linear(8, 16) shapes).
    weight = jax.random.normal(kw, (OUT, IN), dtype=jnp.float32) * 0.1
    bias = jax.random.normal(kb, (OUT,), dtype=jnp.float32) * 0.1
    # The free global `other` from the test program, modeled deterministically.
    other = jax.random.normal(ko, (OUT,), dtype=jnp.float32)

    # Parameter packing is done once (constant-folded / hoisted in a real model).
    params = pack_params(weight, bias, other)

    def ref_fn(x):
        return jnp.maximum(x @ weight.T + bias + other, 0.0)

    # 1) Run the Pallas kernel at the tiny module-sized batch.
    out = jax.block_until_ready(linear_add_relu_pallas(x1, params))
    assert out.shape == (B, OUT)
    assert jnp.allclose(out, ref_fn(x1), atol=1e-5, rtol=1e-5)

    # 2) Exercise the lane-dense, multi-block (grid >= 2) path.
    B2 = 768
    x2 = jax.random.normal(kx2, (B2, IN), dtype=jnp.float32)
    out2 = jax.block_until_ready(linear_add_relu_pallas(x2, params))
    assert out2.shape == (B2, OUT)
    assert jnp.allclose(out2, ref_fn(x2), atol=1e-5, rtol=1e-5)

    # 3) Dispatcher sanity (tiny batch takes the fused-XLA path).
    out3 = jax.block_until_ready(linear_add_relu(x1, params))
    assert jnp.allclose(out3, ref_fn(x1), atol=1e-5, rtol=1e-5)

    print("KERNEL_OK")
</pallas_src>

<mosaic_0001>
module attributes {stable_mosaic.version = 11 : i64} {
  func.func @_fused_linear_kernel(%arg0: i32, %arg1: memref<8x8xf32, #tpu.memory_space<vmem>>, %arg2: memref<16x9xf32, #tpu.memory_space<vmem>>, %arg3: memref<16x8xf32, #tpu.memory_space<vmem>>) attributes {dimension_semantics = [#tpu.dimension_semantics<parallel>], iteration_bounds = array<i64: 1>, scalar_prefetch = 0 : i64, scratch_operands = 0 : i64, tpu.core_type = #tpu.core_type<tc>, window_params = [{transform_indices = @transform_0, window_bounds = array<i64: 8, 8>}, {pipeline_mode = #tpu.pipeline_mode<synchronous>, transform_indices = @transform_1, window_bounds = array<i64: 16, 9>}, {transform_indices = @transform_2, window_bounds = array<i64: 16, 8>}]} {
    %c0 = arith.constant 0 : index
    %c0_0 = arith.constant 0 : index
    %0 = vector.load %arg2[%c0, %c0_0] : memref<16x9xf32, #tpu.memory_space<vmem>>, vector<16x8xf32>
    %c0_1 = arith.constant 0 : index
    %c8 = arith.constant 8 : index
    %1 = vector.load %arg2[%c0_1, %c8] : memref<16x9xf32, #tpu.memory_space<vmem>>, vector<16x1xf32>
    %c0_2 = arith.constant 0 : index
    %c0_3 = arith.constant 0 : index
    %2 = vector.load %arg1[%c0_2, %c0_3] : memref<8x8xf32, #tpu.memory_space<vmem>>, vector<8x8xf32>
    %cst = arith.constant dense<0.000000e+00> : vector<16x8xf32>
    %3 = tpu.matmul %0, %2, %cst {dimension_numbers = #tpu.dot_dimension_numbers<[1], [0], [0], [1], [0, 0, 1, 1], [], []>} : vector<16x8xf32>, vector<8x8xf32>, vector<16x8xf32> -> vector<16x8xf32>
    %4 = vector.broadcast %1 : vector<16x1xf32> to vector<16x8xf32>
    %5 = arith.addf %3, %4 : vector<16x8xf32>
    %cst_4 = arith.constant 0.000000e+00 : f32
    %6 = vector.broadcast %cst_4 : f32 to vector<16x8xf32>
    %7 = arith.maximumf %5, %6 : vector<16x8xf32>
    %c0_5 = arith.constant 0 : index
    %c0_6 = arith.constant 0 : index
    %8 = vector.load %arg3[%c0_5, %c0_6] : memref<16x8xf32, #tpu.memory_space<vmem>>, vector<16x8xf32>
    tpu.vector_store %arg3[%c0_5, %c0_6], %7 {strides = array<i32>} : memref<16x8xf32, #tpu.memory_space<vmem>>, vector<16x8xf32>,
    return
  }
  func.func @transform_0(%arg0: i32) -> (i32, i32) {
    %c0_i32 = arith.constant 0 : i32
    %c0_i32_0 = arith.constant 0 : i32
    return %c0_i32, %arg0 : i32, i32
  }
  func.func @transform_1(%arg0: i32) -> (i32, i32) {
    %c0_i32 = arith.constant 0 : i32
    %c0_i32_0 = arith.constant 0 : i32
    %c0_i32_1 = arith.constant 0 : i32
    return %c0_i32, %c0_i32_0 : i32, i32
  }
  func.func @transform_2(%arg0: i32) -> (i32, i32) {
    %c0_i32 = arith.constant 0 : i32
    %c0_i32_0 = arith.constant 0 : i32
    return %c0_i32, %arg0 : i32, i32
  }
}

</mosaic_0001>

<bundles_post_ra>
// kernel: tpu_custom_call.1
= control target key start
LH: loop header
LB: loop body
LE: loop exit
PB: predicated region body
PF: predicated region fallthrough
CT: control target
= control target key end

     0   :  { %7 = vsyncpa [#allocation3], 0  ;;  %s189_s0 = inlined_call_operand.hbm [shape: f32[8,8], index: 0, kind: input, shape index: {}]   ;;  %s190_s1 = inlined_call_operand.hbm [shape: f32[16,9], index: 1, kind: input, shape index: {}]   ;;  %s191_s2 = inlined_call_operand.vmem [shape: f32[16,8], index: 2, kind: output, shape index: {}]  }
   0x1   :  { %s14_s11 = sshll.u32 %s189_s0, 4  ;;  %s15_s11 = int_to_ptr.hbm [resolvable:$true] %s14_s11 }
   0x2   :  { %8 = vsyncpa [#allocation5], 0  ;;  %s153_s12 = smov [#allocation2]   ;;  %s24_s16 = sshll.u32 %s190_s1, 4  ;;  %s25_s16 = int_to_ptr.hbm [resolvable:$true] %s24_s16 }
   0x3   :  { %s16_s13 = sshll.u32 %s153_s12, 4  ;;  %s154_s17 = smov [#allocation4]   ;;  %s17_s13 = int_to_ptr.vmem [resolvable:$true] %s16_s13 }
   0x4   :  { %19 = dma.hbm_to_vmem [thread:$0]  %s15_s11, 128, %s17_s13, [#allocation3]  }
   0x5   :  { %s26_s18 = sshll.u32 %s154_s17, 4  ;;  %s155_s19 = smov 128   ;;  %s27_s18 = int_to_ptr.vmem [resolvable:$true] %s26_s18 }
   0x6   :  { %s156_s20 = smov 8  }
   0x7   :  { %32 = dma.hbm_to_vmem [thread:$0]  %s25_s16, 256, %s27_s18, [#allocation5], %s155_s19, %s155_s19, %s156_s20  }
   0x8   :  { %149 = dma.done.wait [#allocation3], 128  }
   0x9   :  { %150 = vsyncadd [#allocation3], 4294967168 }
   0xa   :  { %151 = dma.done.wait [#allocation5], 256  }
   0xb   :  { %152 = vsyncadd [#allocation5], 4294967040  ;;  %v157_v0 = vmov 8   ;;  %vm54_vm0 = vcmask 64512   ;;  %v43_v1 = vld [vmem:[#allocation2] sm:$0xff]  ;;  %v41_v2 = vld [vmem:[#allocation4] sm:$0xff] }
   0xc   :  { %100 = vset.pattern.permute.xlu0 %v157_v0  ;;  %v42_v3 = vld [vmem:[#allocation4 + $0x8] sm:$0xff]  ;;  %74 = vmatpush.msra.mxu0 %v43_v1 }
   0xd   :  { %94 = vmatpush.msra.mxu1 %v43_v1  ;;  %46 = vperm.xlu0 %100, %v41_v2  }
   0xe   :  { %92 = vmatmul.msk.f32.vlgmr.msra.gmra.mxu0 %vm54_vm0, %v41_v2  ;;  %93 = vmatmul.msk.f32.vlgmr.msra.gmra.mxu1 %vm54_vm0, %v42_v3 }
  0x15   :  { %51 = vperm.xlu0 %100, %v42_v3  }
  0x7f   :  { %v47_v4 = vpop.permute.xlu0 %46 }
  0x87   :  { %v52_v6 = vpop.permute.xlu0 %51 }
  0x8b   :  { %v76_v5 = vpop.f32.mrf.mxu0  ;;  %v79_v8 = vpop.f32.mrf.mxu1 }
  0x8c   :  { %v77_v7 = vadd.f32 %v76_v5, %v47_v4  ;;  %v80_v9 = vadd.f32 %v79_v8, %v52_v6 }
  0x8e   :  { %v82_v10 = vmax.f32 %v77_v7, 0.0  ;;  %v83_v11 = vmax.f32 %v80_v9, 0.0 }
  0x90   :  { %84 = vst.msk [vmem:[%s191_s2] sm:$0xff] %vm54_vm0, %v82_v10 }
  0x91   :  { %85 = vst.msk [vmem:[%s191_s2 + $0x8] sm:$0xff] %vm54_vm0, %v83_v11 }
  0x92   :  { %90 = vsyncpa [#allocation3], 1 }
  0x93   :  { %91 = vsyncpa [#allocation5], 1 }

</bundles_post_ra>
